<compile_context>
chip_gen: v7x
topology: tpu7x:2x2x1
jax: 0.10.0
libtpu: 0.0.40
codegen_flags: <defaults>
</compile_context>

<pallas_src>
import functools

import numpy as np
import jax
import jax.numpy as jnp
from jax.experimental import pallas as pl
from jax.experimental.pallas import tpu as pltpu


@functools.lru_cache(maxsize=None)
def _pil_bicubic_weights(in_size: int, out_size: int) -> np.ndarray:
    """Exact PIL ImagingResample bicubic weights (a = -0.5, antialiased)."""
    a = -0.5

    def kern(x):
        x = np.abs(x)
        return np.where(
            x < 1.0, (a + 2.0) * x**3 - (a + 3.0) * x**2 + 1.0,
            np.where(x < 2.0, a * x**3 - 5.0 * a * x**2 + 8.0 * a * x - 4.0 * a, 0.0),
        )

    scale = in_size / out_size
    filterscale = max(scale, 1.0)
    support = 2.0 * filterscale  # bicubic support = 2.0, scaled for downscale
    W = np.zeros((out_size, in_size), dtype=np.float32)
    for xx in range(out_size):
        center = (xx + 0.5) * scale
        xmin = int(max(0, np.floor(center - support)))
        xmax = int(min(in_size, np.ceil(center + support)))
        idx = np.arange(xmin, xmax, dtype=np.float64)
        w = kern((idx - center + 0.5) / filterscale)
        w = w / w.sum()
        W[xx, xmin:xmax] = w.astype(np.float32)
    return W


@functools.lru_cache(maxsize=None)
def _split_weights_T(in_size: int, out_size: int):
    """(in, out) transposed weights split into a bf16 hi+lo pair (device arrays).

    Cached so repeated calls at a fixed resolution neither recompute the numpy
    weight loops nor re-upload the weights to the device.
    """
    wT = jnp.asarray(_pil_bicubic_weights(in_size, out_size).T)  # (in, out) f32
    hi = wT.astype(jnp.bfloat16)
    lo = (wT - hi.astype(jnp.float32)).astype(jnp.bfloat16)
    return hi, lo


def _vmem_capacity_bytes() -> int:
    """Generation-aware VMEM size (128 MiB v5e/v6e, 64 MiB per TC on v7x)."""
    try:
        return int(pltpu.get_tpu_info().vmem_capacity_bytes)
    except Exception:
        return 64 * 1024 * 1024  # conservative fallback (v7x per-TensorCore)


def _pick_tiling(n: int, h: int, w: int, vmem_capacity: int):
    """TB images per grid step, number of grid blocks, padded image count.

    The budget covers one f32 (TB, H, W) input block; the real VMEM peak is
    roughly 2x that (double buffering) plus in-kernel temporaries plus the
    (small, bf16) weights and the output block, so the budget stays well under
    the vmem limit.
    """
    if vmem_capacity >= 96 * 1024 * 1024:   # v5e / v6e (128 MiB physical)
        block_budget = 24 * 1024 * 1024
    else:                                   # v7x (64 MiB per TensorCore)
        block_budget = 10 * 1024 * 1024
    per_img = h * w * 4
    tb = max(1, min(n, block_budget // per_img))
    # Keep at least 2 grid steps so dimension_semantics=("parallel",) can shard
    # the grid over both v7x TensorCores (an extra step is ~free on v5e/v6e).
    if n >= 2:
        tb = min(tb, (n + 1) // 2)
    nblk = -(-n // tb)  # ceil: N is padded up instead of forcing TB | N
    return tb, nblk, nblk * tb


def _bicubic_kernel(x_ref, ww_hi_ref, ww_lo_ref, wh_hi_ref, wh_lo_ref, o_ref):
    # x_ref:         (TB, H, W) f32 in [0, 1]
    # ww_hi/lo_ref:  (W, W_new) bf16 horizontal weights (transposed, hi+lo split)
    # wh_hi/lo_ref:  (H, H_new) bf16 vertical weights   (transposed, hi+lo split)
    # o_ref:         (TB, W_new, H_new) f32 (H/W swapped; wrapper undoes it)
    TB, H, W = x_ref.shape
    W_new = ww_hi_ref.shape[1]
    H_new = wh_hi_ref.shape[1]

    # to_pil_image: float tensor -> .mul(255).byte()  (truncation; exact for x in [0,1]).
    xq = jnp.floor(x_ref[...] * 255.0)
    # Integers 0..255 are exactly representable in bf16 -> lossless cast.
    xb = xq.astype(jnp.bfloat16).reshape(TB * H, W)

    # Horizontal pass: 2 native MXU passes with f32 accumulation.
    t = jnp.dot(xb, ww_hi_ref[...], preferred_element_type=jnp.float32)
    t = t + jnp.dot(xb, ww_lo_ref[...], preferred_element_type=jnp.float32)
    # t: (TB*H, W_new)

    # Vertical pass: transpose the downscaled intermediate so M = TB*W_new is
    # large; split it into a bf16 hi+lo pair -> 3 MXU passes (lo*lo dropped,
    # residual ~2^-16 of full scale).
    t = jnp.swapaxes(t.reshape(TB, H, W_new), 1, 2).reshape(TB * W_new, H)
    t_hi = t.astype(jnp.bfloat16)
    t_lo = (t - t_hi.astype(jnp.float32)).astype(jnp.bfloat16)
    y = jnp.dot(t_hi, wh_hi_ref[...], preferred_element_type=jnp.float32)
    y = y + jnp.dot(t_hi, wh_lo_ref[...], preferred_element_type=jnp.float32)
    y = y + jnp.dot(t_lo, wh_hi_ref[...], preferred_element_type=jnp.float32)
    # y: (TB*W_new, H_new)

    # PIL clips and rounds half-away-from-zero to uint8; to_tensor divides by 255.
    yq = jnp.clip(jnp.floor(y + 0.5), 0.0, 255.0) * (1.0 / 255.0)
    # Stored H/W-swapped (lane dim = H_new, unmasked vst when H_new % 128 == 0):
    # saves the second in-kernel XLU transpose + relayout; the wrapper swaps the
    # axes of the scale^2-smaller output instead.
    o_ref[...] = yq.reshape(TB, W_new, H_new)


def batch_bicubic(x: jax.Array, scale: int = 4) -> jax.Array:
    """Pallas equivalent of BatchBicubic(scale).forward(x) for NCHW float input."""
    B, C, H, W = x.shape
    if float(scale).is_integer():
        H_new, W_new = H // int(scale), W // int(scale)
    else:
        H_new, W_new = int(H / scale), int(W / scale)
    N = B * C

    ww_hi, ww_lo = _split_weights_T(W, W_new)  # (W, W_new) bf16 hi/lo
    wh_hi, wh_lo = _split_weights_T(H, H_new)  # (H, H_new) bf16 hi/lo

    vmem_cap = _vmem_capacity_bytes()
    TB, nblk, N_pad = _pick_tiling(N, H, W, vmem_cap)

    xv = x.reshape(N, H, W).astype(jnp.float32)
    if N_pad != N:
        # Pad B*C up to a multiple of TB (e.g. prime N) instead of collapsing TB to 1.
        xv = jnp.pad(xv, ((0, N_pad - N), (0, 0), (0, 0)))

    # 96 MiB limit on v5e/v6e; ~48 MiB on v7x (keeps peak under its 64 MiB VMEM).
    vmem_limit = int(min(96 * 1024 * 1024, (vmem_cap * 3) // 4))

    # TODO(synk): for very large H/W the weight rows are ~4*scale-banded; tiling
    # output columns into 128/256-lane blocks and contracting each against only
    # its input band would cut dense MXU work and weight VMEM by ~W_new/128.
    # TODO(synk): the constant weight blocks are still double-buffered by the
    # default pipeline; pipeline_mode=pl.Buffered(1) on their specs would reclaim
    # that copy (omitted here for lowering portability).
    out = pl.pallas_call(
        _bicubic_kernel,
        out_shape=jax.ShapeDtypeStruct((N_pad, W_new, H_new), jnp.float32),
        grid_spec=pltpu.PrefetchScalarGridSpec(
            num_scalar_prefetch=0,
            grid=(nblk,),
            in_specs=[
                pl.BlockSpec((TB, H, W), lambda i: (i, 0, 0)),
                pl.BlockSpec((W, W_new), lambda i: (0, 0)),  # constant -> fetched once
                pl.BlockSpec((W, W_new), lambda i: (0, 0)),
                pl.BlockSpec((H, H_new), lambda i: (0, 0)),
                pl.BlockSpec((H, H_new), lambda i: (0, 0)),
            ],
            out_specs=pl.BlockSpec((TB, W_new, H_new), lambda i: (i, 0, 0)),
        ),
        compiler_params=pltpu.CompilerParams(
            dimension_semantics=("parallel",),
            vmem_limit_bytes=vmem_limit,
        ),
    )(xv, ww_hi, ww_lo, wh_hi, wh_lo)

    # Drop padding and undo the H/W swap in XLA: the output is scale^2 smaller
    # than the input, so this transpose is essentially free and off the per-step
    # critical path. Then back to NCHW.
    out = jnp.swapaxes(out[:N], 1, 2)  # (N, H_new, W_new)
    return out.reshape(B, C, H_new, W_new)


if __name__ == "__main__":
    key = jax.random.PRNGKey(0)
    # Small NCHW input consistent with the module (values in [0, 1] like an image tensor).
    x = jax.random.uniform(key, (2, 4, 16, 16), dtype=jnp.float32)

    y = batch_bicubic(x, scale=4)
    jax.block_until_ready(y)

    assert y.shape == (2, 4, 4, 4), y.shape
    assert y.dtype == jnp.float32, y.dtype

    # Reference: same separable resample in float64 (single final rounding).
    x_np = np.asarray(x).reshape(8, 16, 16)
    wwT = _pil_bicubic_weights(16, 4).T.astype(np.float64)
    whT = _pil_bicubic_weights(16, 4).T.astype(np.float64)
    xq = np.floor(x_np * np.float32(255.0)).astype(np.float64)
    t = np.swapaxes(xq @ wwT, 1, 2)            # (N, W_new, H)
    yr = np.swapaxes(t @ whT, 1, 2)            # (N, H_new, W_new)
    ref = (np.clip(np.floor(yr + 0.5), 0.0, 255.0) / 255.0).reshape(2, 4, 4, 4)
    max_err = float(np.max(np.abs(np.asarray(y, dtype=np.float64) - ref)))
    # Allow at most one 8-bit quantization step of deviation (rounding flips).
    assert max_err <= 1.0 / 255.0 + 1e-6, max_err

    print("KERNEL_OK")
</pallas_src>

<mosaic_0001>
module attributes {stable_mosaic.version = 11 : i64} {
  func.func @_bicubic_kernel(%arg0: i32, %arg1: memref<4x16x16xf32, #tpu.memory_space<vmem>>, %arg2: memref<16x4xbf16, #tpu.memory_space<vmem>>, %arg3: memref<16x4xbf16, #tpu.memory_space<vmem>>, %arg4: memref<16x4xbf16, #tpu.memory_space<vmem>>, %arg5: memref<16x4xbf16, #tpu.memory_space<vmem>>, %arg6: memref<4x4x4xf32, #tpu.memory_space<vmem>>) attributes {dimension_semantics = [#tpu.dimension_semantics<parallel>], iteration_bounds = array<i64: 2>, scalar_prefetch = 0 : i64, scratch_operands = 0 : i64, tpu.core_type = #tpu.core_type<tc>, window_params = [{transform_indices = @transform_0, window_bounds = array<i64: 4, 16, 16>}, {pipeline_mode = #tpu.pipeline_mode<synchronous>, transform_indices = @transform_1, window_bounds = array<i64: 16, 4>}, {pipeline_mode = #tpu.pipeline_mode<synchronous>, transform_indices = @transform_2, window_bounds = array<i64: 16, 4>}, {pipeline_mode = #tpu.pipeline_mode<synchronous>, transform_indices = @transform_3, window_bounds = array<i64: 16, 4>}, {pipeline_mode = #tpu.pipeline_mode<synchronous>, transform_indices = @transform_4, window_bounds = array<i64: 16, 4>}, {transform_indices = @transform_5, window_bounds = array<i64: 4, 4, 4>}]} {
    %c0 = arith.constant 0 : index
    %c0_0 = arith.constant 0 : index
    %c0_1 = arith.constant 0 : index
    %0 = vector.load %arg1[%c0, %c0_0, %c0_1] : memref<4x16x16xf32, #tpu.memory_space<vmem>>, vector<4x16x16xf32>
    %cst = arith.constant 2.550000e+02 : f32
    %1 = vector.broadcast %cst : f32 to vector<4x16x16xf32>
    %2 = arith.mulf %0, %1 : vector<4x16x16xf32>
    %3 = math.floor %2 : vector<4x16x16xf32>
    %4 = arith.truncf %3 : vector<4x16x16xf32> to vector<4x16x16xbf16>
    %5 = vector.shape_cast %4 : vector<4x16x16xbf16> to vector<64x16xbf16>
    %c0_2 = arith.constant 0 : index
    %c0_3 = arith.constant 0 : index
    %6 = vector.load %arg2[%c0_2, %c0_3] : memref<16x4xbf16, #tpu.memory_space<vmem>>, vector<16x4xbf16>
    %cst_4 = arith.constant dense<0.000000e+00> : vector<64x4xf32>
    %7 = tpu.matmul %5, %6, %cst_4 {dimension_numbers = #tpu.dot_dimension_numbers<[1], [0], [0], [1], [0, 0, 1, 1], [], []>} : vector<64x16xbf16>, vector<16x4xbf16>, vector<64x4xf32> -> vector<64x4xf32>
    %c0_5 = arith.constant 0 : index
    %c0_6 = arith.constant 0 : index
    %8 = vector.load %arg3[%c0_5, %c0_6] : memref<16x4xbf16, #tpu.memory_space<vmem>>, vector<16x4xbf16>
    %cst_7 = arith.constant dense<0.000000e+00> : vector<64x4xf32>
    %9 = tpu.matmul %5, %8, %cst_7 {dimension_numbers = #tpu.dot_dimension_numbers<[1], [0], [0], [1], [0, 0, 1, 1], [], []>} : vector<64x16xbf16>, vector<16x4xbf16>, vector<64x4xf32> -> vector<64x4xf32>
    %10 = arith.addf %7, %9 : vector<64x4xf32>
    %11 = vector.shape_cast %10 : vector<64x4xf32> to vector<4x16x4xf32>
    %12 = tpu.transpose %11, [0, 2, 1] : vector<4x16x4xf32> -> vector<4x4x16xf32>
    %13 = vector.shape_cast %12 : vector<4x4x16xf32> to vector<16x16xf32>
    %14 = arith.truncf %13 : vector<16x16xf32> to vector<16x16xbf16>
    %15 = arith.extf %14 : vector<16x16xbf16> to vector<16x16xf32>
    %16 = arith.subf %13, %15 : vector<16x16xf32>
    %17 = arith.truncf %16 : vector<16x16xf32> to vector<16x16xbf16>
    %c0_8 = arith.constant 0 : index
    %c0_9 = arith.constant 0 : index
    %18 = vector.load %arg4[%c0_8, %c0_9] : memref<16x4xbf16, #tpu.memory_space<vmem>>, vector<16x4xbf16>
    %cst_10 = arith.constant dense<0.000000e+00> : vector<16x4xf32>
    %19 = tpu.matmul %14, %18, %cst_10 {dimension_numbers = #tpu.dot_dimension_numbers<[1], [0], [0], [1], [0, 0, 1, 1], [], []>} : vector<16x16xbf16>, vector<16x4xbf16>, vector<16x4xf32> -> vector<16x4xf32>
    %c0_11 = arith.constant 0 : index
    %c0_12 = arith.constant 0 : index
    %20 = vector.load %arg5[%c0_11, %c0_12] : memref<16x4xbf16, #tpu.memory_space<vmem>>, vector<16x4xbf16>
    %cst_13 = arith.constant dense<0.000000e+00> : vector<16x4xf32>
    %21 = tpu.matmul %14, %20, %cst_13 {dimension_numbers = #tpu.dot_dimension_numbers<[1], [0], [0], [1], [0, 0, 1, 1], [], []>} : vector<16x16xbf16>, vector<16x4xbf16>, vector<16x4xf32> -> vector<16x4xf32>
    %22 = arith.addf %19, %21 : vector<16x4xf32>
    %c0_14 = arith.constant 0 : index
    %c0_15 = arith.constant 0 : index
    %23 = vector.load %arg4[%c0_14, %c0_15] : memref<16x4xbf16, #tpu.memory_space<vmem>>, vector<16x4xbf16>
    %cst_16 = arith.constant dense<0.000000e+00> : vector<16x4xf32>
    %24 = tpu.matmul %17, %23, %cst_16 {dimension_numbers = #tpu.dot_dimension_numbers<[1], [0], [0], [1], [0, 0, 1, 1], [], []>} : vector<16x16xbf16>, vector<16x4xbf16>, vector<16x4xf32> -> vector<16x4xf32>
    %25 = arith.addf %22, %24 : vector<16x4xf32>
    %cst_17 = arith.constant 5.000000e-01 : f32
    %26 = vector.broadcast %cst_17 : f32 to vector<16x4xf32>
    %27 = arith.addf %25, %26 : vector<16x4xf32>
    %28 = math.floor %27 : vector<16x4xf32>
    %cst_18 = arith.constant 0.000000e+00 : f32
    %cst_19 = arith.constant 2.550000e+02 : f32
    %29 = vector.broadcast %cst_18 : f32 to vector<16x4xf32>
    %30 = arith.maximumf %29, %28 : vector<16x4xf32>
    %31 = vector.broadcast %cst_19 : f32 to vector<16x4xf32>
    %32 = arith.minimumf %31, %30 : vector<16x4xf32>
    %cst_20 = arith.constant 0.00392156886 : f32
    %33 = vector.broadcast %cst_20 : f32 to vector<16x4xf32>
    %34 = arith.mulf %32, %33 : vector<16x4xf32>
    %35 = vector.shape_cast %34 : vector<16x4xf32> to vector<4x4x4xf32>
    %c0_21 = arith.constant 0 : index
    %c0_22 = arith.constant 0 : index
    %c0_23 = arith.constant 0 : index
    %36 = vector.load %arg6[%c0_21, %c0_22, %c0_23] : memref<4x4x4xf32, #tpu.memory_space<vmem>>, vector<4x4x4xf32>
    tpu.vector_store %arg6[%c0_21, %c0_22, %c0_23], %35 {strides = array<i32>} : memref<4x4x4xf32, #tpu.memory_space<vmem>>, vector<4x4x4xf32>,
    return
  }
  func.func @transform_0(%arg0: i32) -> (i32, i32, i32) {
    %c0_i32 = arith.constant 0 : i32
    %c0_i32_0 = arith.constant 0 : i32
    %c0_i32_1 = arith.constant 0 : i32
    return %arg0, %c0_i32, %c0_i32_0 : i32, i32, i32
  }
  func.func @transform_1(%arg0: i32) -> (i32, i32) {
    %c0_i32 = arith.constant 0 : i32
    %c0_i32_0 = arith.constant 0 : i32
    %c0_i32_1 = arith.constant 0 : i32
    return %c0_i32, %c0_i32_0 : i32, i32
  }
  func.func @transform_2(%arg0: i32) -> (i32, i32) {
    %c0_i32 = arith.constant 0 : i32
    %c0_i32_0 = arith.constant 0 : i32
    %c0_i32_1 = arith.constant 0 : i32
    return %c0_i32, %c0_i32_0 : i32, i32
  }
  func.func @transform_3(%arg0: i32) -> (i32, i32) {
    %c0_i32 = arith.constant 0 : i32
    %c0_i32_0 = arith.constant 0 : i32
    %c0_i32_1 = arith.constant 0 : i32
    return %c0_i32, %c0_i32_0 : i32, i32
  }
  func.func @transform_4(%arg0: i32) -> (i32, i32) {
    %c0_i32 = arith.constant 0 : i32
    %c0_i32_0 = arith.constant 0 : i32
    %c0_i32_1 = arith.constant 0 : i32
    return %c0_i32, %c0_i32_0 : i32, i32
  }
  func.func @transform_5(%arg0: i32) -> (i32, i32, i32) {
    %c0_i32 = arith.constant 0 : i32
    %c0_i32_0 = arith.constant 0 : i32
    %c0_i32_1 = arith.constant 0 : i32
    return %arg0, %c0_i32, %c0_i32_0 : i32, i32, i32
  }
}

</mosaic_0001>

<bundles_post_ra>
// kernel: tpu_custom_call.1
= control target key start
LH: loop header
LB: loop body
LE: loop exit
PB: predicated region body
PF: predicated region fallthrough
CT: control target
= control target key end

     0   :  { %10 = vsyncpa [#allocation3], 0  ;;  %s1203_s0 = inlined_call_operand.hbm [shape: f32[8,16,16], index: 0, kind: input, shape index: {}]   ;;  %s1204_s1 = inlined_call_operand.vmem [shape: bf16[16,4], index: 1, kind: input, shape index: {}]   ;;  %s1205_s2 = inlined_call_operand.vmem [shape: bf16[16,4], index: 2, kind: input, shape index: {}]   ;;  %s1206_s3 = inlined_call_operand.vmem [shape: bf16[16,4], index: 3, kind: input, shape index: {}]   ;;  %s1207_s4 = inlined_call_operand.vmem [shape: bf16[16,4], index: 4, kind: input, shape index: {}]   ;;  %s1208_s5 = inlined_call_operand.vmem [shape: f32[8,4,4], index: 5, kind: output, shape index: {}]  }
   0x1   :  { %12 = vsyncpa [#allocation3 + $0x1], 0  ;;  %s1070_s18 = smov 0   ;;  %s1072_s19 = smov 0  }
   0x2   :  { %s1074_s20 = smov 0   ;;  %s1076_s21 = smov 0  }
   0x3 LB: > { %s829_s22 = sadd.s32 4294967295, %s1033_s21   ;;  %s1090_s23 = sadd.s32 1, %s1033_s21   ;;  %s1033_s21 = sphi %s1076_s21, %s1215_s21   ;;  %s1029_s20 = sphi %s1074_s20, %s1214_s20   ;;  %s1025_s19 = sphi %s1072_s19, %s1213_s19   ;;  %s1021_s18 = sphi %s1070_s18, %s1212_s18  }
   0x4   : > { %s22_s24 = ssub.s32 %s1033_s21, %s1090_s23  ;;  %s25_s25 = sadd.s32 1, %s1029_s20 }
   0x5   : > { %p23_p0 = scmp.eq.s32.totalorder %s22_s24, 0  ;;  %p32_p1 = scmp.ne.s32.totalorder %s1029_s20, %s1025_s19 }
   0x6   : > { %p33_p2 = scmp.eq.s32.totalorder %s1033_s21, 0  ;;  %p38_p3 = scmp.ne.s32.totalorder %s1025_s19, %s1021_s18 }
   0x7   : > { %s1100_s26 = scalar_select %p23_p0, %s1029_s20, %s25_s25  }
   0x8   : > { %p34_p4 = por %p33_p2, %p32_p1  ;;  %p39_p5 = scmp.eq.s32.totalorder %s829_s22, 0 }
   0x9   : > { %p928_p6 = scmp.lt.s32.totalorder %s1033_s21, 2  ;;  %s184_s28 = sand.u32 1, %s1029_s20  }
   0xa   : > { %p1105_p7 = por %p39_p5, %p38_p3  ;;  %s833_s29 = sshll.u32 %s184_s28, 6 }
   0xb   : > { %s859_s30 = sshll.u32 %s1033_s21, 10  ;;  %s188_s9 = scalar_lea.vmem [#allocation2], %s833_s29 }
   0xc   : > { %s1114_s8 = scalar_lea.hbm %s1203_s0, %s859_s30  ;;  %s196_s10 = sshll.u32 %s188_s9, 4  ;;  %s1116_s10 = int_to_ptr.vmem [resolvable:$true] %s196_s10 }
   0xd   : > { %p1118_p8 = pnand %p928_p6, %p34_p4  ;;  %s1123_s12 = scalar_lea.sflag [#allocation3], %s184_s28 }
   0xe   : > { %s969_s13 = scalar_lea.hbm %s1114_s8, 1024  ;;  %s974_s16 = scalar_lea.hbm %s1203_s0, 2048 }
   0xf   : > { %p970_p10 = scmp.ne.s32.totalorder %s1114_s8, %s969_s13  ;;  %p971_p11 = pneg %p1118_p8 }
  0x10   : > { %p975_p0 = scmp.lt.u32.totalorder %s1114_s8, %s1203_s0  ;;  %p976_p1 = scmp.lt.u32.totalorder %s974_s16, %s969_s13 }
  0x11   : > { %p972_p12 = pnand %p971_p11, %p970_p10  ;;  %p978_p3 = scmp.lt.u32.totalorder %s969_s13, %s1114_s8 }
  0x12   : > { %p977_p2 = por %p976_p1, %p975_p0 }
  0x13   : > { %p973_p13 = pneg %p972_p12 }
  0x14   : > { %p979_p4 = por %p978_p3, %p977_p2 }
  0x16   : > { %p980_p5 = pnand %p979_p4, %p973_p13 }
  0x18   : > { %983 = shalt.err (!%p980_p5)
}
  0x19   : > { %s984_s24 = scalar_lea.vmem %s1116_s10, 1024  ;;  %s1035_s25 = smov [#allocation2]  }
  0x1a   : > { %p985_p6 = scmp.ne.s32.totalorder %s1116_s10, %s984_s24  ;;  %s989_s28 = sshll.u32 %s1035_s25, 4  ;;  %s990_s28 = int_to_ptr.vmem [resolvable:$false] %s989_s28 }
  0x1b   : > { %s991_s29 = scalar_lea.vmem %s990_s28, 2048  ;;  %p992_p9 = scmp.lt.s32.totalorder %s1116_s10, %s990_s28 }
  0x1c   : > { %p987_p10 = pnand %p985_p6, %p971_p11  ;;  %p993_p0 = scmp.lt.s32.totalorder %s991_s29, %s984_s24 }
  0x1e   : > { %p988_p12 = pneg %p987_p10  ;;  %p994_p1 = por %p993_p0, %p992_p9 }
  0x20   : > { %p995_p2 = pnand %p994_p1, %p988_p12 }
  0x22   : > { %998 = shalt.err (!%p995_p2)
}
  0x23   : > { %s1036_s30 = smov 128   ;;  %s1037_s6 = smov 8  }
  0x24   : > { %927 = dma.hbm_to_vmem [thread:$0]  (!%p1118_p8), %s1114_s8, 1024, %s1116_s10, %s1123_s12, %s1036_s30, %s1036_s30, %s1037_s6  }
  0x25   : > { %p204_p11 = scmp.lt.s32.totalorder %s1033_s21, 3  ;;  %p1211_p13 = scmp.ge.s32.totalorder %s1033_s21, 1 }
  0x27   : > { %p205_p3 = pnand %p1211_p13, %p204_p11 }
  0x28   : > { %s210_s7 = sand.u32 (!%p205_p3), 1, %s1025_s19  }
  0x29   : > { %208 = sbr.rel (%p205_p3) target bundleno = 673 (0x2a1), region = 40  ;;  %s838_s9 = sshll.u32 (!%p205_p3), %s210_s7, 6 }
  0x2a   : > { %s211_s13 = scalar_lea.sflag (!%p205_p3), [#allocation3], %s210_s7  ;;  %s214_s14 = scalar_lea.vmem (!%p205_p3), [#allocation2], %s838_s9 }
  0x30   : > { %1016 = dma.done.wait (%p1105_p7), %s211_s13, 1024  }
  0x31   : > { %1018 = vsyncadd (%p1105_p7), %s211_s13, 4294966272  ;;  %v965_v0 = vld [vmem:[%s1205_s2] sm:$0xff]   ;;  %v250_v2 = vld [vmem:[%s214_s14 + $0x8] sm:$0xff]  ;;  %vm287_vm0 = vcmask 130048   ;;  %v1038_v34 = vmov 0.0   ;;  %vm1039_vm1 = vmmov 0  }
  0x32   : > { %v249_v1 = vld [vmem:[%s214_s14] sm:$0xff]  ;;  %876 = vmatprep.subr.bf16.mxu0 %v965_v0  ;;  %v258_v4 = vmul.f32 255.0, %v250_v2  ;;  %v251_v6 = vld [vmem:[%s214_s14 + $0x10] sm:$0xff]  ;;  %v252_v7 = vld [vmem:[%s214_s14 + $0x18] sm:$0xff]  ;;  %896 = vmatprep.subr.bf16.mxu1 %v1038_v34  ;;  %s839_s18 = sshll.u32 %s829_s22, 2  ;;  %vm757_vm2 = vcmask 27648  }
  0x33   : > { %v257_v3 = vmul.f32 255.0, %v249_v1  ;;  %v966_v5 = vld [vmem:[%s1204_s1] sm:$0xff]   ;;  %877 = vmatpush3.bf16.msra.mxu0 %v965_v0  ;;  %v259_v8 = vmul.f32 255.0, %v251_v6  ;;  %v254_v10 = vld [vmem:[%s214_s14 + $0x28] sm:$0xff]  ;;  %v260_v13 = vmul.f32 255.0, %v252_v7  ;;  %v255_v15 = vld [vmem:[%s214_s14 + $0x30] sm:$0xff]  ;;  %898 = vmatprep.mubr.msk.bf16.mxu1 %vm1039_vm1, %v1038_v34 }
  0x34   : > { %v253_v9 = vld [vmem:[%s214_s14 + $0x20] sm:$0xff]  ;;  %v266_v12 = vfloor.f32 %v258_v4  ;;  %886 = vmatprep.subr.bf16.mxu0 %v966_v5  ;;  %v256_v16 = vld [vmem:[%s214_s14 + $0x38] sm:$0xff]  ;;  %v262_v18 = vmul.f32 255.0, %v254_v10  ;;  %v263_v19 = vmul.f32 255.0, %v255_v15  ;;  %p243_p7 = scmp.lt.s32.totalorder %s839_s18, 7 }
  0x35   : > { %v265_v11 = vfloor.f32 %v257_v3  ;;  %v261_v14 = vmul.f32 255.0, %v253_v9  ;;  %v267_v17 = vfloor.f32 %v259_v8  ;;  %v268_v21 = vfloor.f32 %v260_v13  ;;  %v967_v38 = vld [vmem:[%s1207_s4] sm:$0xff]  }
  0x36   : > { %v264_v23 = vmul.f32 255.0, %v256_v16  ;;  %v270_v24 = vfloor.f32 %v262_v18  ;;  %v271_v27 = vfloor.f32 %v263_v19  ;;  %897 = vmatpush3.bf16.msra.mxu1 %v967_v38  ;;  %v968_v46 = vld [vmem:[%s1206_s3] sm:$0xff]   ;;  %s1217_s18 = smov (!%p243_p7, %s839_s18), 7 }
  0x37   : > { %v273_v20 = vpack.c.bf16 %v266_v12, %v265_v11  ;;  %v269_v22 = vfloor.f32 %v261_v14  ;;  %v274_v25 = vpack.c.bf16 %v268_v21, %v267_v17  ;;  %902 = vmatprep.subr.bf16.mxu1 %v1038_v34  ;;  %s840_s24 = sshll.u32 %s1217_s18, 2 }
  0x38   : > { %v272_v28 = vfloor.f32 %v264_v23  ;;  %s246_s21 = scalar_lea.vmem %s1208_s5, %s840_s24 }
  0x39   : > { %878 = vmatprep.mubr.msk.bf16.mxu0 %vm287_vm0, %v273_v20  ;;  %v275_v26 = vpack.c.bf16 %v270_v24, %v269_v22 }
  0x3a   : > { %879 = vmatmul.mubr.msk.bf16.vlgmr.msra.gmra.mrb[0].mxu0 %vm287_vm0, %v274_v25  ;;  %v276_v29 = vpack.c.bf16 %v272_v28, %v271_v27 }
  0x3b   : > { %887 = vmatpush3.bf16.msra.mxu0 %v966_v5  ;;  %882 = vmatprep.mubr.msk.bf16.mxu0 %vm287_vm0, %v275_v26 }
  0x42   : > { %883 = vmatmul.mubr.msk.bf16.gmra.mrb[4].mxu0 %vm287_vm0, %v276_v29 }
  0x43   : > { %888 = vmatprep.mubr.msk.bf16.mxu0 %vm287_vm0, %v273_v20 }
  0x4a   : > { %889 = vmatmul.mubr.msk.bf16.vlgmr.msra.gmra.mrb[0].mxu0 %vm287_vm0, %v274_v25 }
  0x4b   : > { %892 = vmatprep.mubr.msk.bf16.mxu0 %vm287_vm0, %v275_v26 }
  0x52   : > { %893 = vmatmul.mubr.msk.bf16.gmra.mrb[4].mxu0 %vm287_vm0, %v276_v29 }
 0x11d   : > { %v890_v30 = vpop.f32.mrb[0].mxu0 }
 0x11e   : > { %468 = vxpose.xlu1.b32.start [1/2] (short) (narrow) %v890_v30, 8  ;;  %v405_v31 = vpop.f32.mrb[1].mxu0 }
 0x11f   : > { %436 = vxpose.xlu0.b32.start [1/2] (short) (narrow) %v405_v31, 8  ;;  %v891_v32 = vpop.f32.mrb[2].mxu0 }
 0x120   : > { %v408_v33 = vpop.f32.mrb[3].mxu0 }
 0x122   : > { %469 = vxpose.xlu1.b32.end [2/2] (short) (narrow) %v891_v32, 8 }
 0x123   : > { %437 = vxpose.xlu0.b32.end [2/2] (short) (narrow) %v408_v33, 8 }
 0x125   : > { %v894_v35 = vpop.f32.mrb[4].mxu0 }
 0x126   : > { %532 = vxpose.xlu1.b32.start [1/2] (short) (narrow) %v894_v35, 8  ;;  %v421_v36 = vpop.f32.mrb[5].mxu0 }
 0x127   : > { %500 = vxpose.xlu0.b32.start [1/2] (short) (narrow) %v421_v36, 8  ;;  %v895_v37 = vpop.f32.mrb[6].mxu0 }
 0x128   : > { %v424_v39 = vpop.f32.mrb[7].mxu0 }
 0x12a   : > { %533 = vxpose.xlu1.b32.end [2/2] (short) (narrow) %v895_v37, 8 }
 0x12b   : > { %501 = vxpose.xlu0.b32.end [2/2] (short) (narrow) %v424_v39, 8 }
 0x19e   : > { %v484_v40 = vpop.trf.xlu1 }
 0x19f   : > { %v452_v41 = vpop.trf.xlu0 }
 0x1a0   : > { %v568_v44 = vcombine.low %v452_v41, %v484_v40 }
 0x1a6   : > { %v548_v42 = vpop.trf.xlu1 }
 0x1a7   : > { %v516_v43 = vpop.trf.xlu0 }
 0x1a8   : > { %v569_v45 = vcombine.low %v516_v43, %v548_v42 }
 0x1aa   : > { %v572_v47 = vpack.c.bf16 %v569_v45, %v568_v44 }
 0x1ac   : > { %v573_v48 = vunpack.c.l.bf16 %v572_v47  ;;  %v574_v49 = vunpack.c.h.bf16 %v572_v47  ;;  %899 = vmatmul.mubr.msk.bf16.vlgmr.msra.gmra.mrb[0].mxu1 %vm287_vm0, %v572_v47 }
 0x1ad   : > { %903 = vmatpush3.bf16.msra.mxu1 %v968_v46  ;;  %904 = vmatprep.mubr.msk.bf16.mxu1 %vm1039_vm1, %v1038_v34 }
 0x1ae   : > { %v577_v50 = vcombine.high %v573_v48, %v573_v48  ;;  %v578_v51 = vcombine.high %v574_v49, %v574_v49  ;;  %908 = vmatprep.subr.bf16.mxu1 %v1038_v34  ;;  %v581_v54 = vsub.f32 %v452_v41, %v573_v48  ;;  %v583_v55 = vsub.f32 %v516_v43, %v574_v49 }
 0x1b0   : > { %v582_v52 = vsub.f32 %v484_v40, %v577_v50  ;;  %v584_v53 = vsub.f32 %v548_v42, %v578_v51 }
 0x1b2   : > { %v589_v56 = vcombine.low %v581_v54, %v582_v52  ;;  %v590_v57 = vcombine.low %v583_v55, %v584_v53 }
 0x1b4   : > { %905 = vmatmul.mubr.msk.bf16.vlgmr.msra.gmra.mrb[4].mxu1 %vm287_vm0, %v572_v47  ;;  %v593_v58 = vpack.c.bf16 %v590_v57, %v589_v56 }
 0x1b5   : > { %909 = vmatpush3.bf16.msra.mxu1 %v968_v46  ;;  %910 = vmatprep.mubr.msk.bf16.mxu1 %vm1039_vm1, %v1038_v34 }
 0x1bc   : > { %911 = vmatmul.mubr.msk.bf16.vlgmr.msra.gmra.mrb[8].mxu1 %vm287_vm0, %v593_v58 }
 0x27f   : > { %v641_v59 = vpop.f32.mrb[0].mxu1 }
 0x280   : > { %v900_v60 = vpop.f32.mrb[1].mxu1 }
 0x281   : > { %v644_v61 = vpop.f32.mrb[2].mxu1 }
 0x282   : > { %v901_v62 = vpop.f32.mrb[3].mxu1 }
 0x287   : > { %v688_v63 = vpop.f32.mrb[4].mxu1 }
 0x288   : > { %v689_v0 = vadd.f32 %v688_v63, %v641_v59  ;;  %v906_v1 = vpop.f32.mrb[5].mxu1 }
 0x289   : > { %v691_v2 = vpop.f32.mrb[6].mxu1 }
 0x28a   : > { %v692_v3 = vadd.f32 %v691_v2, %v644_v61  ;;  %v907_v4 = vpop.f32.mrb[7].mxu1 }
 0x28f   : > { %v732_v5 = vpop.f32.mrb[8].mxu1 }
 0x290   : > { %v739_v6 = vadd.f32 %v732_v5, %v689_v0  ;;  %v912_v7 = vpop.f32.mrb[9].mxu1 }
 0x291   : > { %v735_v8 = vpop.f32.mrb[10].mxu1 }
 0x292   : > { %v741_v9 = vadd.f32 0.5, %v739_v6  ;;  %v740_v10 = vadd.f32 %v735_v8, %v692_v3  ;;  %v913_v11 = vpop.f32.mrb[11].mxu1 }
 0x294   : > { %v743_v12 = vfloor.f32 %v741_v9  ;;  %v742_v13 = vadd.f32 0.5, %v740_v10 }
 0x296   : > { %v745_v14 = vmax.f32 %v743_v12, 0.0  ;;  %v744_v15 = vfloor.f32 %v742_v13 }
 0x298   : > { %v747_v16 = vmin.f32 %v745_v14, 255.0  ;;  %v746_v17 = vmax.f32 %v744_v15, 0.0 }
 0x29a   : > { %v749_v18 = vmul.f32 0.003921569, %v747_v16  ;;  %v748_v19 = vmin.f32 %v746_v17, 255.0 }
 0x29c   : > { %v753_v20 = vcombine.high %v749_v18, %v749_v18  ;;  %758 = vst.msk [vmem:[%s246_s21] sm:$0xf] %vm757_vm2, %v749_v18  ;;  %v750_v21 = vmul.f32 0.003921569, %v748_v19 }
 0x29e   : > { %759 = vst.msk [vmem:[%s246_s21 + $0x4] sm:$0xf] %vm757_vm2, %v753_v20  ;;  %v754_v22 = vcombine.high %v750_v21, %v750_v21  ;;  %760 = vst.msk [vmem:[%s246_s21 + $0x8] sm:$0xf] %vm757_vm2, %v750_v21 }
 0x2a0   : > { %761 = vst.msk [vmem:[%s246_s21 + $0xc] sm:$0xf] %vm757_vm2, %v754_v22 }
 0x2a1 PF: > { %p15_p8 = scmp.ge.s32.totalorder %s1090_s23, 4   ;;  %s1212_s18 = smov %s1025_s19 }
 0x2a2   : > { %s1213_s19 = smov %s1029_s20  ;;  %s1214_s20 = smov %s1100_s26 }
 0x2a3   : > { %s1215_s21 = smov %s1090_s23  ;;  %17 = sbr.rel (!%p15_p8) target bundleno = 3 (0x3), region = 80 }
 0x2aa   :  { %784 = vsyncpa [#allocation3], 1 }
 0x2ab   :  { %786 = vsyncpa [#allocation3 + $0x1], 1 }

</bundles_post_ra>
